<compile_context>
chip_gen: v6e
topology: v6e:2x2x1
jax: 0.10.0
libtpu: 0.0.40
codegen_flags: <defaults>
</compile_context>

<pallas_src>
import functools

import jax
import jax.numpy as jnp
from jax.experimental import pallas as pl
from jax.experimental.pallas import tpu as pltpu

_MiB = 1024 * 1024


def _vmem_budgets():
    """(fused_budget_bytes, vmem_limit_bytes) derived from the chip's VMEM."""
    try:
        cap = int(pltpu.get_tpu_info().vmem_capacity_bytes)
    except Exception:
        cap = 64 * _MiB  # conservative fallback: v7x per-TensorCore VMEM
    # Scoped VMEM limit: ~110 MiB on 128-MiB chips (v5e/v6e), 48 MiB on v7x.
    vmem_limit = max(min(int(cap * 0.86), cap - 16 * _MiB), 32 * _MiB)
    # Pipeline-buffer budget for choosing fused vs tiled and for tile sizing:
    # ~96 MiB on v5e/v6e, ~40 MiB on v7x (keeps double-buffering alive).
    fused_budget = max(min(int(cap * 0.75), vmem_limit - 8 * _MiB), 16 * _MiB)
    return fused_budget, vmem_limit


def _round_up(x, m):
    return ((x + m - 1) // m) * m


# ---------------------------------------------------------------------------
# Path 1: fused single pass, grid = (N,), block = one whole (C, HW) image.
# 2x HBM traffic (one read + one write of x).
# ---------------------------------------------------------------------------
def _ese_fused_kernel(x_ref, w_ref, b_ref, o_ref):
    # x_ref: (1, C, HW) native dtype | w_ref: (C, C) x.dtype | b_ref: (C, 1) f32
    x = x_ref[...]                                        # no whole-tile upcast
    inv_hw = jnp.float32(1.0 / x.shape[-1])
    # Global average pool: lane-axis reduce accumulated in f32 -> (C, 1).
    pooled = jnp.sum(x[0], axis=-1, keepdims=True, dtype=jnp.float32) * inv_hw
    # 1x1 conv as (C, C) @ (C, 1); MXU accumulates in f32.
    gate = jnp.dot(w_ref[...], pooled.astype(w_ref.dtype),
                   preferred_element_type=jnp.float32)
    gate = jax.nn.sigmoid(gate + b_ref[...])              # (C, 1) f32
    gate = gate.astype(x.dtype)                           # cast once
    o_ref[...] = x * gate[None]                           # (1,C,HW) * (1,C,1)


def _ese_fused(x_flat, w_x, b_f32, vmem_limit):
    N, C, HW = x_flat.shape
    return pl.pallas_call(
        _ese_fused_kernel,
        out_shape=jax.ShapeDtypeStruct((N, C, HW), x_flat.dtype),
        grid_spec=pltpu.PrefetchScalarGridSpec(
            num_scalar_prefetch=0,
            grid=(N,),
            in_specs=[
                pl.BlockSpec((1, C, HW), lambda n: (n, 0, 0)),
                # Constant blocks: same block index every step -> not re-fetched.
                pl.BlockSpec((C, C), lambda n: (0, 0)),
                pl.BlockSpec((C, 1), lambda n: (0, 0)),
            ],
            out_specs=pl.BlockSpec((1, C, HW), lambda n: (n, 0, 0)),
        ),
        compiler_params=pltpu.CompilerParams(
            dimension_semantics=("parallel",),
            vmem_limit_bytes=vmem_limit,
        ),
    )(x_flat, w_x, b_f32)


# ---------------------------------------------------------------------------
# Path 2: HW-tiled two-pass path for large images (3x HBM traffic).
#   pass 1: per-image channel sums (accumulator resident over the HW tiles)
#   pass 2: gate math (scale / matvec / sigmoid) + broadcast multiply, fused
# ---------------------------------------------------------------------------
def _pool_sum_kernel(x_ref, s_ref, *, hw_total):
    # x_ref: (1, C, T) native dtype | s_ref: (1, C, 1) f32 accumulator resident
    # across the (last, "arbitrary") HW-tile grid axis.
    T = x_ref.shape[-1]

    @pl.when(pl.program_id(1) == 0)
    def _():
        s_ref[...] = jnp.zeros_like(s_ref)

    x = x_ref[...]
    if hw_total % T != 0:
        # Last tile is partial (grid uses cdiv): zero the out-of-range lanes so
        # whatever sits in the unwritten part of the VMEM buffer is ignored.
        lane = jax.lax.broadcasted_iota(jnp.int32, x.shape, 2)
        lane = lane + pl.program_id(1) * T
        x = jnp.where(lane < hw_total, x, jnp.zeros((), x.dtype))
    s_ref[...] += jnp.sum(x, axis=-1, keepdims=True, dtype=jnp.float32)


def _apply_gate_kernel(s_ref, w_ref, b_ref, x_ref, o_ref, *, inv_hw):
    # s_ref: (1, C, 1) f32 sums | w_ref: (C, C) x.dtype | b_ref: (C, 1) f32
    # x_ref/o_ref: (1, C, T).  Gate recompute per tile is a tiny matvec +
    # C sigmoids (EUP), negligible vs. the tile's HBM traffic; it removes the
    # XLA gate ops and HBM round-trip of the gate between the two passes and
    # keeps both grid axes "parallel".
    x = x_ref[...]
    pooled = s_ref[0] * jnp.float32(inv_hw)                # (C, 1) f32
    gate = jnp.dot(w_ref[...], pooled.astype(w_ref.dtype),
                   preferred_element_type=jnp.float32)
    gate = jax.nn.sigmoid(gate + b_ref[...]).astype(x.dtype)
    o_ref[...] = x * gate[None]
    # Out-of-range lanes of a partial last tile are dropped by the masked
    # edge-block store, so no input masking is needed here.


def _ese_tiled(x_flat, w_x, b_f32, t_pool, t_apply, vmem_limit):
    N, C, HW = x_flat.shape

    # Pass 1: per-image channel sums (f32 accumulation across HW tiles).
    sums = pl.pallas_call(
        functools.partial(_pool_sum_kernel, hw_total=HW),
        out_shape=jax.ShapeDtypeStruct((N, C, 1), jnp.float32),
        grid_spec=pltpu.PrefetchScalarGridSpec(
            num_scalar_prefetch=0,
            grid=(N, pl.cdiv(HW, t_pool)),
            in_specs=[pl.BlockSpec((1, C, t_pool), lambda n, t: (n, 0, t))],
            out_specs=pl.BlockSpec((1, C, 1), lambda n, t: (n, 0, 0)),
        ),
        compiler_params=pltpu.CompilerParams(
            dimension_semantics=("parallel", "arbitrary"),
            vmem_limit_bytes=vmem_limit,
        ),
    )(x_flat)

    # Pass 2: gate = sigmoid(W @ mean + b); out = x * gate.  Lane-dense tiles
    # (multiples of 128) keep the writeback as unmasked vst.
    return pl.pallas_call(
        functools.partial(_apply_gate_kernel, inv_hw=1.0 / HW),
        out_shape=jax.ShapeDtypeStruct((N, C, HW), x_flat.dtype),
        grid_spec=pltpu.PrefetchScalarGridSpec(
            num_scalar_prefetch=0,
            grid=(N, pl.cdiv(HW, t_apply)),
            in_specs=[
                pl.BlockSpec((1, C, 1), lambda n, t: (n, 0, 0)),
                pl.BlockSpec((C, C), lambda n, t: (0, 0)),
                pl.BlockSpec((C, 1), lambda n, t: (0, 0)),
                pl.BlockSpec((1, C, t_apply), lambda n, t: (n, 0, t)),
            ],
            out_specs=pl.BlockSpec((1, C, t_apply), lambda n, t: (n, 0, t)),
        ),
        compiler_params=pltpu.CompilerParams(
            dimension_semantics=("parallel", "parallel"),
            vmem_limit_bytes=vmem_limit,
        ),
    )(sums, w_x, b_f32, x_flat)


def _pick_tiles(HW, C, itemsize, wbytes, budget, forced=None):
    """Per-pass lane-tile sizes (multiples of 128; HW need not divide)."""
    hw_pad = _round_up(HW, 128)
    if forced is not None:
        # Validate/round user overrides so they never violate the (8,128) rule.
        t = min(_round_up(max(int(forced), 128), 128), hw_pad)
        return t, t
    # Pool pass: only the input is double-buffered (the (1,C,1) accumulator is
    # resident), so budget with a 2x factor -> ~2x bigger tile, fewer steps.
    t_pool = (budget // (2 * C * itemsize)) // 128 * 128
    # Apply pass: input + output double-buffered plus the weight/bias/sums
    # blocks -> 4x factor after subtracting the constant-block footprint.
    avail = max(budget - 2 * wbytes, 0)
    t_apply = (avail // (4 * C * itemsize)) // 128 * 128
    t_pool = max(128, min(t_pool, hw_pad))
    t_apply = max(128, min(t_apply, hw_pad))
    return t_pool, t_apply


def ese_module(x_nchw, weight, bias, *, hw_tile=None):
    """ESE forward pass.

    x_nchw: (N, C, H, W); weight: (C_out, C_in) from the 1x1 conv; bias: (C,).
    hw_tile: optional override forcing the HW-tiled two-pass path.
    """
    N, C, H, W = x_nchw.shape
    HW = H * W

    # Free contiguous reshape -- no transpose, no extra HBM traffic.
    x_flat = x_nchw.reshape(N, C, HW)
    itemsize = x_flat.dtype.itemsize

    fused_budget, vmem_limit = _vmem_budgets()

    # Carry the 1x1-conv weight in x.dtype (halves its footprint for bf16);
    # bias stays f32 (tiny) so the pre-sigmoid add is done in f32.
    w_x = weight.astype(x_flat.dtype)
    b_f32 = bias.astype(jnp.float32).reshape(C, 1)
    wbytes = C * C * itemsize + C * 4

    # Double-buffered in+out image blocks + double-buffered constant blocks.
    fused_bytes = 4 * C * HW * itemsize + 2 * wbytes

    if hw_tile is None and fused_bytes <= fused_budget:
        out_flat = _ese_fused(x_flat, w_x, b_f32, vmem_limit)
    else:
        t_pool, t_apply = _pick_tiles(HW, C, itemsize, wbytes,
                                      fused_budget, hw_tile)
        out_flat = _ese_tiled(x_flat, w_x, b_f32, t_pool, t_apply, vmem_limit)

    return out_flat.reshape(N, C, H, W)


def _reference(x_nchw, weight, bias):
    pooled = jnp.mean(x_nchw, axis=(2, 3))                       # (N, C)
    gate = jax.nn.sigmoid(pooled @ weight.T + bias)              # (N, C)
    return x_nchw * gate[:, :, None, None]


if __name__ == "__main__":
    key = jax.random.PRNGKey(0)
    kx, kw, kb, kx2 = jax.random.split(key, 4)

    N, C, H, W = 2, 4, 16, 16
    x = jax.random.normal(kx, (N, C, H, W), dtype=jnp.float32)
    # deterministic synthetic Conv2d(channels, channels, 1) parameters
    weight = jax.random.normal(kw, (C, C), dtype=jnp.float32) * 0.1
    bias = jax.random.normal(kb, (C,), dtype=jnp.float32) * 0.1

    ref = _reference(x, weight, bias)

    # Fused single-pass path (auto-selected at this size).
    out = ese_module(x, weight, bias)
    jax.block_until_ready(out)
    assert out.shape == (N, C, H, W)
    assert jnp.allclose(out, ref, atol=1e-5, rtol=1e-5)

    # HW-tiled two-pass path (the large-image fallback), forced with a
    # 128-wide lane-dense tile; HW=256 divides exactly.
    out_t = ese_module(x, weight, bias, hw_tile=128)
    jax.block_until_ready(out_t)
    assert jnp.allclose(out_t, ref, atol=1e-5, rtol=1e-5)

    # Non-divisible HW (12*12=144): exercises the cdiv grid, the masked
    # partial-tile pool reduce, and the masked edge-block store in apply.
    C2 = 8
    x2 = jax.random.normal(kx2, (2, C2, 12, 12), dtype=jnp.float32)
    w2 = jax.random.normal(kw, (C2, C2), dtype=jnp.float32) * 0.1
    b2 = jax.random.normal(kb, (C2,), dtype=jnp.float32) * 0.1
    ref2 = _reference(x2, w2, b2)
    out2 = ese_module(x2, w2, b2, hw_tile=128)
    jax.block_until_ready(out2)
    assert jnp.allclose(out2, ref2, atol=1e-5, rtol=1e-5)

    print("KERNEL_OK")
</pallas_src>

<mosaic_0001>
module attributes {stable_mosaic.version = 11 : i64} {
  func.func @_ese_fused_kernel(%arg0: i32, %arg1: memref<1x4x256xf32, #tpu.memory_space<vmem>>, %arg2: memref<4x4xf32, #tpu.memory_space<vmem>>, %arg3: memref<4x1xf32, #tpu.memory_space<vmem>>, %arg4: memref<1x4x256xf32, #tpu.memory_space<vmem>>) attributes {dimension_semantics = [#tpu.dimension_semantics<parallel>], iteration_bounds = array<i64: 2>, scalar_prefetch = 0 : i64, scratch_operands = 0 : i64, tpu.core_type = #tpu.core_type<tc>, window_params = [{transform_indices = @transform_0, window_bounds = array<i64: 1, 4, 256>}, {pipeline_mode = #tpu.pipeline_mode<synchronous>, transform_indices = @transform_1, window_bounds = array<i64: 4, 4>}, {pipeline_mode = #tpu.pipeline_mode<synchronous>, transform_indices = @transform_2, window_bounds = array<i64: 4, 1>}, {transform_indices = @transform_3, window_bounds = array<i64: 1, 4, 256>}]} {
    %c0 = arith.constant 0 : index
    %c0_0 = arith.constant 0 : index
    %c0_1 = arith.constant 0 : index
    %0 = vector.load %arg1[%c0, %c0_0, %c0_1] : memref<1x4x256xf32, #tpu.memory_space<vmem>>, vector<1x4x256xf32>
    %1 = vector.shape_cast %0 : vector<1x4x256xf32> to vector<4x256xf32>
    %cst = arith.constant dense<0.000000e+00> : vector<4xf32>
    %2 = vector.multi_reduction <add>, %1, %cst [1] : vector<4x256xf32> to vector<4xf32>
    %3 = vector.shape_cast %2 : vector<4xf32> to vector<4x1xf32>
    %cst_2 = arith.constant 3.906250e-03 : f32
    %4 = vector.broadcast %cst_2 : f32 to vector<4x1xf32>
    %5 = arith.mulf %3, %4 : vector<4x1xf32>
    %c0_3 = arith.constant 0 : index
    %c0_4 = arith.constant 0 : index
    %6 = vector.load %arg2[%c0_3, %c0_4] : memref<4x4xf32, #tpu.memory_space<vmem>>, vector<4x4xf32>
    %cst_5 = arith.constant dense<0.000000e+00> : vector<4x1xf32>
    %7 = tpu.matmul %6, %5, %cst_5 {dimension_numbers = #tpu.dot_dimension_numbers<[1], [0], [0], [1], [0, 0, 1, 1], [], []>} : vector<4x4xf32>, vector<4x1xf32>, vector<4x1xf32> -> vector<4x1xf32>
    %c0_6 = arith.constant 0 : index
    %c0_7 = arith.constant 0 : index
    %8 = vector.load %arg3[%c0_6, %c0_7] : memref<4x1xf32, #tpu.memory_space<vmem>>, vector<4x1xf32>
    %9 = arith.addf %7, %8 : vector<4x1xf32>
    %10 = arith.negf %9 : vector<4x1xf32>
    %11 = math.exp %10 : vector<4x1xf32>
    %cst_8 = arith.constant 1.000000e+00 : f32
    %12 = vector.broadcast %cst_8 : f32 to vector<4x1xf32>
    %13 = arith.addf %12, %11 : vector<4x1xf32>
    %14 = arith.divf %12, %13 : vector<4x1xf32>
    %15 = vector.shape_cast %14 : vector<4x1xf32> to vector<1x4x1xf32>
    %16 = vector.broadcast %15 : vector<1x4x1xf32> to vector<1x4x256xf32>
    %17 = arith.mulf %0, %16 : vector<1x4x256xf32>
    %c0_9 = arith.constant 0 : index
    %c0_10 = arith.constant 0 : index
    %c0_11 = arith.constant 0 : index
    %18 = vector.load %arg4[%c0_9, %c0_10, %c0_11] : memref<1x4x256xf32, #tpu.memory_space<vmem>>, vector<1x4x256xf32>
    tpu.vector_store %arg4[%c0_9, %c0_10, %c0_11], %17 {strides = array<i32>} : memref<1x4x256xf32, #tpu.memory_space<vmem>>, vector<1x4x256xf32>,
    return
  }
  func.func @transform_0(%arg0: i32) -> (i32, i32, i32) {
    %c0_i32 = arith.constant 0 : i32
    %c0_i32_0 = arith.constant 0 : i32
    %c0_i32_1 = arith.constant 0 : i32
    return %arg0, %c0_i32, %c0_i32_0 : i32, i32, i32
  }
  func.func @transform_1(%arg0: i32) -> (i32, i32) {
    %c0_i32 = arith.constant 0 : i32
    %c0_i32_0 = arith.constant 0 : i32
    %c0_i32_1 = arith.constant 0 : i32
    return %c0_i32, %c0_i32_0 : i32, i32
  }
  func.func @transform_2(%arg0: i32) -> (i32, i32) {
    %c0_i32 = arith.constant 0 : i32
    %c0_i32_0 = arith.constant 0 : i32
    %c0_i32_1 = arith.constant 0 : i32
    return %c0_i32, %c0_i32_0 : i32, i32
  }
  func.func @transform_3(%arg0: i32) -> (i32, i32, i32) {
    %c0_i32 = arith.constant 0 : i32
    %c0_i32_0 = arith.constant 0 : i32
    %c0_i32_1 = arith.constant 0 : i32
    return %arg0, %c0_i32, %c0_i32_0 : i32, i32, i32
  }
}

</mosaic_0001>

<bundles_post_ra>
// kernel: tpu_custom_call.1
= control target key start
LH: loop header
LB: loop body
LE: loop exit
PB: predicated region body
PF: predicated region fallthrough
CT: control target
= control target key end

     0   :  { %8 = vsyncpa [#allocation3], 0  ;;  %s735_s0 = inlined_call_operand.hbm [shape: f32[2,4,256], index: 0, kind: input, shape index: {}]   ;;  %s736_s1 = inlined_call_operand.vmem [shape: f32[4,4], index: 1, kind: input, shape index: {}]   ;;  %s737_s2 = inlined_call_operand.vmem [shape: f32[4,1], index: 2, kind: input, shape index: {}]   ;;  %s738_s3 = inlined_call_operand.hbm [shape: f32[2,4,256], index: 3, kind: output, shape index: {}]  }
   0x1   :  { %10 = vsyncpa [#allocation3 + $0x1], 0 }
   0x2   :  { %11 = vsyncpa [#allocation4], 0 }
   0x3   :  { %13 = vsyncpa [#allocation4 + $0x1], 0  ;;  %s584_s12 = smov 0   ;;  %s586_s13 = smov 0  }
   0x4   :  { %s588_s14 = smov 0   ;;  %s590_s15 = smov 0  }
   0x5 LB: > { %s605_s16 = sadd.s32 4294967295, %s556_s15   ;;  %s382_s17 = sadd.s32 4294967294, %s556_s15   ;;  %s556_s15 = sphi %s590_s15, %s755_s15   ;;  %s552_s14 = sphi %s588_s14, %s754_s14   ;;  %s548_s13 = sphi %s586_s13, %s753_s13   ;;  %s544_s12 = sphi %s584_s12, %s752_s12  }
   0x6   : > { %s609_s18 = sadd.s32 1, %s556_s15   ;;  %s26_s19 = sadd.s32 1, %s552_s14 }
   0x7   : > { %s23_s20 = ssub.s32 %s556_s15, %s609_s18  ;;  %p33_p0 = scmp.ne.s32.totalorder %s552_s14, %s548_s13 }
   0x8   : > { %p24_p1 = scmp.eq.s32.totalorder %s23_s20, 0  ;;  %p34_p2 = scmp.eq.s32.totalorder %s556_s15, 0 }
   0x9   : > { %p39_p3 = scmp.ne.s32.totalorder %s548_s13, %s544_s12  ;;  %p40_p4 = scmp.eq.s32.totalorder %s605_s16, 0 }
   0xa   : > { %s621_s21 = scalar_select %p24_p1, %s552_s14, %s26_s19  }
   0xb   : > { %p623_p5 = por %p34_p2, %p33_p0  ;;  %p627_p6 = por %p40_p4, %p39_p3 }
   0xc   : > { %p105_p7 = scmp.eq.s32.totalorder %s605_s16, 1  ;;  %p111_p8 = scmp.eq.s32.totalorder %s382_s17, 1 }
   0xd   : > { %s742_s23 = scalar_select %p627_p6, 1, 0 }
   0xe   : > { %p420_p10 = scmp.lt.s32.totalorder %s556_s15, 2  ;;  %p634_p11 = por %p105_p7, %p33_p0 }
   0xf   : > { %p638_p12 = por %p111_p8, %p39_p3  ;;  %s137_s26 = sand.u32 1, %s552_s14  }
  0x10   : > { %s743_s24 = scalar_select %p634_p11, 1, 0 }
  0x11   : > { %s744_s25 = scalar_select %p638_p12, 1, 0 }
  0x12   : > { %s399_s27 = sshll.u32 %s556_s15, 7  ;;  %s385_s28 = sshll.u32 %s137_s26, 3 }
  0x13   : > { %s647_s4 = scalar_lea.hbm %s735_s0, %s399_s27  ;;  %s141_s5 = scalar_lea.vmem [#allocation2], %s385_s28 }
  0x14   : > { %s149_s6 = sshll.u32 %s141_s5, 4  ;;  %p651_p13 = pnand %p420_p10, %p623_p5  ;;  %s655_s6 = int_to_ptr.vmem [resolvable:$true] %s149_s6 }
  0x15   : > { %s138_s8 = scalar_lea.sflag [#allocation3], %s137_s26  ;;  %s464_s9 = scalar_lea.hbm %s647_s4, 128 }
  0x16   : > { %p465_p2 = scmp.ne.s32.totalorder %s647_s4, %s464_s9  ;;  %p466_p3 = pneg %p651_p13 }
  0x17   : > { %s469_s17 = scalar_lea.hbm %s735_s0, 256  ;;  %p470_p5 = scmp.lt.s32.totalorder %s647_s4, %s735_s0 }
  0x18   : > { %p467_p4 = pnand %p466_p3, %p465_p2  ;;  %p471_p8 = scmp.lt.s32.totalorder %s469_s17, %s464_s9 }
  0x1a   : > { %p468_p7 = pneg %p467_p4  ;;  %p472_p10 = por %p471_p8, %p470_p5 }
  0x1c   : > { %p473_p9 = pnand %p472_p10, %p468_p7 }
  0x1e   : > { %476 = shalt.err (!%p473_p9)
}
  0x1f   : > { %s477_s22 = scalar_lea.vmem %s655_s6, 128  ;;  %s558_s26 = smov [#allocation2]  }
  0x20   : > { %p478_p0 = scmp.ne.s32.totalorder %s655_s6, %s477_s22  ;;  %s482_s27 = sshll.u32 %s558_s26, 4  ;;  %s483_s27 = int_to_ptr.vmem [resolvable:$false] %s482_s27 }
  0x21   : > { %s484_s28 = scalar_lea.vmem %s483_s27, 256  ;;  %p485_p4 = scmp.lt.s32.totalorder %s655_s6, %s483_s27 }
  0x22   : > { %p480_p1 = pnand %p478_p0, %p466_p3  ;;  %p486_p12 = scmp.lt.s32.totalorder %s484_s28, %s477_s22 }
  0x24   : > { %p481_p2 = pneg %p480_p1  ;;  %p487_p11 = por %p486_p12, %p485_p4 }
  0x26   : > { %p488_p6 = pnand %p487_p11, %p481_p2 }
  0x28   : > { %491 = shalt.err (!%p488_p6)
}
  0x29   : > { %415 = dma.hbm_to_vmem [thread:$0]  (!%p651_p13), %s647_s4, 128, %s655_s6, %s138_s8  }
  0x2a   : > { %p746_p9 = scmp.lt.s32.totalorder %s556_s15, 3  ;;  %p747_p7 = scmp.ge.s32.totalorder %s556_s15, 1 }
  0x2c   : > { %p155_p0 = pnand %p747_p7, %p746_p9 }
  0x2d   : > { %s682_s29 = sand.u32 (!%p155_p0), 1, %s548_s13   ;;  %p748_p6 = scmp.ne.s32.totalorder (!%p155_p0), %s742_s23, 0 }
  0x2e   : > { %158 = sbr.rel (%p155_p0) target bundleno = 567 (0x237), region = 32  ;;  %s389_s30 = sshll.u32 (!%p155_p0), %s682_s29, 3 }
  0x2f   : > { %s161_s5 = scalar_lea.sflag (!%p155_p0), [#allocation3], %s682_s29  ;;  %s164_s7 = scalar_lea.vmem (!%p155_p0), [#allocation2], %s389_s30 }
  0x33   : > { %535 = dma.done.wait (%p748_p6), %s161_s5, 128  }
  0x34   : > { %537 = vsyncadd (%p748_p6), %s161_s5, 4294967168  ;;  %vm191_vm0 = vcmask 1043456   ;;  %v187_v0 = vld [vmem:[%s164_s7] sm:$0xff]  ;;  %v559_v5 = vmov 0.0   ;;  %vm560_vm1 = vmmov 0   ;;  %vm200_vm2 = vcmask 31744  }
  0x35   : > { %v189_v1 = vcombine.high %v187_v0, %v187_v0  ;;  %v192_v2 = vsel %vm191_vm0, %v187_v0, 0.0  ;;  %403 = vmatprep.subr.mxu0 %v559_v5  ;;  %405 = vmatprep.mubr.msk.f32.mxu0 %vm560_vm1, %v559_v5  ;;  %v198_v8 = vld [vmem:[%s736_s1] sm:$0xf]  ;;  %v561_v9 = vmov 0   ;;  %v562_v18 = vmov 839922192  }
  0x36   : > { %458 = vset.pattern.permute.xlu0 %v561_v9  ;;  %v199_v10 = vld [vmem:[%s737_s2] sm:$0xf]  ;;  %v288_v19 = vunpack.c.l.s4 %v562_v18  ;;  %v290_v20 = vlaneseq  ;;  %s400_s9 = sshll.u32 %s605_s16, 7  ;;  %s186_s10 = scalar_lea.vmem [#allocation5], %s389_s30 }
  0x37   : > { %v193_v3 = vsel %vm191_vm0, %v189_v1, 0.0  ;;  %s312_s11 = sshll.u32 %s186_s10, 4  ;;  %s310_s20 = scalar_lea.hbm %s738_s3, %s400_s9  ;;  %s313_s11 = int_to_ptr.vmem [resolvable:$true] %s312_s11 }
  0x38   : > { %v194_v4 = vadd.f32 %v193_v3, %v192_v2  ;;  %v289_v21 = vunpack.c.0.s8 %v288_v19  ;;  %v291_v22 = vshrl.u32 %v290_v20, 7  ;;  %s298_s22 = scalar_lea.sflag [#allocation4], %s682_s29  ;;  %s492_s26 = scalar_lea.vmem %s313_s11, 128 }
  0x39   : > { %p493_p11 = scmp.ne.s32.totalorder %s313_s11, %s492_s26  ;;  %p749_p12 = scmp.ne.s32.totalorder %s743_s24, 0 }
  0x3a   : > { %195 = vadd.xlane.f32.xlu0 %v194_v4  ;;  %v292_v23 = vsub.s32 %v289_v21, %v291_v22  ;;  %s563_s27 = smov [#allocation5]  }
  0x3b   : > { %p494_p13 = pnand %p493_p11, %p749_p12  ;;  %s496_s28 = sshll.u32 %s563_s27, 4  ;;  %s497_s28 = int_to_ptr.vmem [resolvable:$false] %s496_s28 }
  0x3c   : > { %s498_s16 = scalar_lea.vmem %s497_s28, 256  ;;  %p499_p3 = scmp.lt.s32.totalorder %s313_s11, %s497_s28 }
  0x3d   : > { %p495_p1 = pneg %p494_p13  ;;  %p500_p5 = scmp.lt.s32.totalorder %s498_s16, %s492_s26 }
  0x3f   : > { %p501_p8 = por %p500_p5, %p499_p3 }
  0x41   : > { %p502_p10 = pnand %p501_p8, %p495_p1 }
  0xc3   : > { %v196_v6 = vpop.xlane.xlu0 %195 }
  0xc4   : > { %v197_v7 = vmul.f32 0.00390625, %v196_v6 }
  0xc6   : > { %404 = vmatpush3.msk.msra.mxu0 %vm191_vm0, %v197_v7 }
  0xc7   : > { %406 = vmatmul.mubr.msk.f32.vlgmr.msra.gmra.mxu0 %vm200_vm2, %v198_v8 }
 0x187   : > { %v273_v11 = vpop.f32.mrf.mxu0 }
 0x188   : > { %v274_v12 = vadd.f32 %v273_v11, %v199_v10 }
 0x189   : > { %v407_v13 = vpop.f32.mrf.mxu0 }
 0x18a   : > { %v393_v14 = vmul.f32 -1.442695, %v274_v12 }
 0x18c   : > { %460 = vpow2.f32 %v393_v14 }
 0x199   : > { %v461_v15 = vpop.eup %460 }
 0x19a   : > { %v280_v16 = vadd.f32 1.0, %v461_v15 }
 0x19c   : > { %462 = vrcp.f32 %v280_v16 }
 0x1a9   : > { %v463_v17 = vpop.eup %462 }
 0x1aa   : > { %285 = vperm.xlu0 %458, %v463_v17  }
 0x225   : > { %v286_v24 = vpop.permute.xlu0 %285 }
 0x226   : > { %v293_v25 = vrot.slane %v286_v24, %v292_v23 }
 0x228   : > { %v295_v26 = vmul.f32 %v293_v25, %v187_v0 }
 0x22a   : > { %296 = vst [vmem:[%s186_s10] sm:$0xff] %v295_v26 }
 0x22b   : > { %505 = shalt.err (!%p502_p10)
}
 0x22c   : > { %s506_s30 = scalar_lea.hbm %s310_s20, 128  ;;  %s510_s7 = scalar_lea.hbm %s738_s3, 256 }
 0x22d   : > { %p507_p2 = scmp.ne.s32.totalorder %s310_s20, %s506_s30  ;;  %p511_p7 = scmp.lt.s32.totalorder %s310_s20, %s738_s3 }
 0x22e   : > { %p512_p0 = scmp.lt.s32.totalorder %s510_s7, %s506_s30 }
 0x22f   : > { %p508_p4 = pnand %p507_p2, %p749_p12 }
 0x230   : > { %p513_p6 = por %p512_p0, %p511_p7 }
 0x231   : > { %p509_p9 = pneg %p508_p4 }
 0x233   : > { %p514_p11 = pnand %p513_p6, %p509_p9 }
 0x235   : > { %517 = shalt.err (!%p514_p11)
}
 0x236   : > { %410 = dma.vmem_to_hbm [thread:$0]  (%p749_p12), %s313_s11, 128, %s310_s20, %s298_s22  }
 0x237 PF: > { %s324_s23 = sand.u32 1, %s544_s12   ;;  %p750_p13 = scmp.ne.s32.totalorder %s744_s25, 0 }
 0x238   : > { %p751_p1 = scmp.ge.s32.totalorder %s556_s15, 2  ;;  %s325_s8 = scalar_lea.sflag [#allocation4], %s324_s23 }
 0x23a   : > { %p417_p3 = pnand %p751_p1, %p750_p13 }
 0x23c   : > { %p418_p5 = pneg %p417_p3 }
 0x23e   : > { %539 = dma.done.wait (%p418_p5), %s325_s8, 128  }
 0x23f   : > { %541 = vsyncadd (%p418_p5), %s325_s8, 4294967168  ;;  %p16_p8 = scmp.ge.s32.totalorder %s609_s18, 4   ;;  %s752_s12 = smov %s548_s13 }
 0x240   : > { %s753_s13 = smov %s552_s14  ;;  %s754_s14 = smov %s621_s21 }
 0x241   : > { %s755_s15 = smov %s609_s18  ;;  %18 = sbr.rel (!%p16_p8) target bundleno = 5 (0x5), region = 77 }
 0x246   :  { %330 = vsyncpa [#allocation3], 1 }
 0x247   :  { %332 = vsyncpa [#allocation3 + $0x1], 1 }
 0x248   :  { %333 = vsyncpa [#allocation4], 1 }
 0x249   :  { %335 = vsyncpa [#allocation4 + $0x1], 1 }

</bundles_post_ra>
